<compile_context>
chip_gen: v5e
topology: v5e:2x2
jax: 0.10.0
libtpu: 0.0.40
codegen_flags: <defaults>
</compile_context>

<pallas_src>
import jax
import jax.numpy as jnp
from jax.experimental import pallas as pl
from jax.experimental.pallas import tpu as pltpu


def _ts_corr_gram_kernel(x_ref, o_ref):
    # x_ref: (g, n, d) -- g fused batch*window rows, n channels, window length d
    # o_ref: (g, n, n) -- full pairwise correlation matrix per window
    x = x_ref[...].astype(jnp.float32)
    d = x.shape[-1]

    xc = x - jnp.mean(x, axis=-1, keepdims=True)               # center over the window

    # cov sums for every channel pair in one batched MXU matmul
    gram = jnp.einsum('gid,gjd->gij', xc, xc,
                      preferred_element_type=jnp.float32)       # (g, n, n)

    # per-channel unbiased std: one sqrt per channel, folded 1/(d-1) constant
    ssq = jnp.sum(xc * xc, axis=-1)                             # (g, n)
    std = jnp.sqrt(ssq * (1.0 / (d - 1)))                       # (g, n)

    # epsilon added AFTER the std product (matches torch); divide -> EUP reciprocal
    denom = std[:, :, None] * std[:, None, :] + 1e-8            # (g, n, n)
    o_ref[...] = (gram * pl.reciprocal(denom, approx=True)).astype(o_ref.dtype)


def ts_corr(X, d=10, stride=10, *,
            vmem_block_bytes=2 * 1024 * 1024, max_block_rows=256):
    B, n, T = X.shape
    w = (T - d) // stride + 1

    # ---- time unfold (plain-JAX glue) ----
    if stride == d:
        unfolded = X[:, :, :w * d].reshape(B, n, w, d)          # free reshape, no gather
    else:
        starts = jnp.arange(w) * stride
        win_idx = starts[:, None] + jnp.arange(d)[None, :]      # (w, d)
        unfolded = X[:, :, win_idx]                             # (B, n, w, d)

    # One relayout to (B*w, n, d) so the kernel sees a single leading batch axis.
    # This single extra HBM pass replaces the old (n-1)x triu pair replication.
    xg = jnp.transpose(unfolded, (0, 2, 1, 3)).reshape(B * w, n, d)

    # ---- block the fused batch*window axis to a VMEM budget ----
    BW = B * w
    row_bytes = 4 * n * max(d, n)                               # max(input row, output row)
    g = max(1, min(BW, vmem_block_bytes // max(row_bytes, 1), max_block_rows))
    if BW >= 2:
        g = min(g, -(-BW // 2))                                 # keep >= 2 grid steps (v7x megacore)
    grid = (pl.cdiv(BW, g),)

    grams = pl.pallas_call(
        _ts_corr_gram_kernel,
        out_shape=jax.ShapeDtypeStruct((BW, n, n), jnp.float32),
        grid=grid,
        in_specs=[pl.BlockSpec((g, n, d), lambda i: (i, 0, 0))],
        out_specs=pl.BlockSpec((g, n, n), lambda i: (i, 0, 0)),
        compiler_params=pltpu.CompilerParams(
            dimension_semantics=("parallel",)),
    )(xg)

    # ---- upper-triangular pair extraction on the small output (plain JAX) ----
    rows, cols = jnp.triu_indices(n, k=1)                       # same order as torch.triu_indices
    corr = grams.reshape(B, w, n, n)[:, :, rows, cols]          # (B, w, h)
    return jnp.transpose(corr, (0, 2, 1))                       # (B, h, w) float32


def _ref_ts_corr(X, d, stride):
    """Pure-JAX reference mirroring the PyTorch forward."""
    B, n, T = X.shape
    w = (T - d) // stride + 1
    starts = jnp.arange(w) * stride
    win_idx = starts[:, None] + jnp.arange(d)[None, :]
    unf = X[:, :, win_idx]
    rows, cols = jnp.triu_indices(n, k=1)
    xr, yr = unf[:, rows], unf[:, cols]
    xm = xr.mean(-1, keepdims=True)
    ym = yr.mean(-1, keepdims=True)
    cov = ((xr - xm) * (yr - ym)).sum(-1)
    std = jnp.sqrt(((xr - xm) ** 2).sum(-1) / (d - 1)) * \
          jnp.sqrt(((yr - ym) ** 2).sum(-1) / (d - 1))
    return cov / (std + 1e-8)


if __name__ == "__main__":
    d, stride = 10, 10

    # shapes consistent with the module defaults: B=2, n=4, T=30 -> h=6 pairs, w=3 windows
    B, n, T = 2, 4, 30
    X = jax.random.normal(jax.random.PRNGKey(0), (B, n, T), dtype=jnp.float32)
    out = ts_corr(X, d=d, stride=stride)
    jax.block_until_ready(out)
    assert out.shape == (B, n * (n - 1) // 2, (T - d) // stride + 1)
    ref = _ref_ts_corr(X, d, stride)
    # tolerance covers the EUP approximate-reciprocal (last-few-ULP-class) error
    assert jnp.allclose(out, ref, atol=5e-3, rtol=5e-3), \
        float(jnp.max(jnp.abs(out - ref)))

    # a second, AlphaNet-like channel count exercising the same gram path
    B2, n2, T2 = 2, 9, 30
    X2 = jax.random.normal(jax.random.PRNGKey(1), (B2, n2, T2), dtype=jnp.float32)
    out2 = ts_corr(X2, d=d, stride=stride)
    jax.block_until_ready(out2)
    assert out2.shape == (B2, n2 * (n2 - 1) // 2, (T2 - d) // stride + 1)
    ref2 = _ref_ts_corr(X2, d, stride)
    assert jnp.allclose(out2, ref2, atol=5e-3, rtol=5e-3), \
        float(jnp.max(jnp.abs(out2 - ref2)))

    print("KERNEL_OK")
</pallas_src>

<mosaic_0001>
module attributes {stable_mosaic.version = 11 : i64} {
  func.func @_ts_corr_gram_kernel(%arg0: i32, %arg1: memref<3x4x10xf32, #tpu.memory_space<vmem>>, %arg2: memref<3x4x4xf32, #tpu.memory_space<vmem>>) attributes {dimension_semantics = [#tpu.dimension_semantics<parallel>], iteration_bounds = array<i64: 2>, scalar_prefetch = 0 : i64, scratch_operands = 0 : i64, tpu.core_type = #tpu.core_type<tc>, window_params = [{transform_indices = @transform_0, window_bounds = array<i64: 3, 4, 10>}, {transform_indices = @transform_1, window_bounds = array<i64: 3, 4, 4>}]} {
    %c0 = arith.constant 0 : index
    %c0_0 = arith.constant 0 : index
    %c0_1 = arith.constant 0 : index
    %0 = vector.load %arg1[%c0, %c0_0, %c0_1] : memref<3x4x10xf32, #tpu.memory_space<vmem>>, vector<3x4x10xf32>
    %cst = arith.constant dense<0.000000e+00> : vector<3x4xf32>
    %1 = vector.multi_reduction <add>, %0, %cst [2] : vector<3x4x10xf32> to vector<3x4xf32>
    %2 = vector.shape_cast %1 : vector<3x4xf32> to vector<3x4x1xf32>
    %cst_2 = arith.constant 1.000000e+01 : f32
    %3 = vector.broadcast %cst_2 : f32 to vector<3x4x1xf32>
    %4 = arith.divf %2, %3 : vector<3x4x1xf32>
    %5 = vector.broadcast %4 : vector<3x4x1xf32> to vector<3x4x10xf32>
    %6 = arith.subf %0, %5 : vector<3x4x10xf32>
    "tpu.trace_start"() <{level = 10 : i32, message = "gid,gjd->gij"}> : () -> ()
    %cst_3 = arith.constant dense<0.000000e+00> : vector<3x4x4xf32>
    %7 = tpu.matmul %6, %6, %cst_3 {dimension_numbers = #tpu.dot_dimension_numbers<[2], [2], [1], [1], [0, 0, 0, 1, 1, 1], [0], [0]>} : vector<3x4x10xf32>, vector<3x4x10xf32>, vector<3x4x4xf32> -> vector<3x4x4xf32>
    "tpu.trace_stop"() : () -> ()
    %8 = arith.mulf %6, %6 : vector<3x4x10xf32>
    %cst_4 = arith.constant dense<0.000000e+00> : vector<3x4xf32>
    %9 = vector.multi_reduction <add>, %8, %cst_4 [2] : vector<3x4x10xf32> to vector<3x4xf32>
    %cst_5 = arith.constant 0.111111112 : f32
    %10 = vector.broadcast %cst_5 : f32 to vector<3x4xf32>
    %11 = arith.mulf %9, %10 : vector<3x4xf32>
    %12 = math.sqrt %11 : vector<3x4xf32>
    %13 = vector.shape_cast %12 : vector<3x4xf32> to vector<3x4x1xf32>
    %14 = vector.shape_cast %12 : vector<3x4xf32> to vector<3x1x4xf32>
    %15 = vector.broadcast %13 : vector<3x4x1xf32> to vector<3x4x4xf32>
    %16 = vector.broadcast %14 : vector<3x1x4xf32> to vector<3x4x4xf32>
    %17 = arith.mulf %15, %16 : vector<3x4x4xf32>
    %cst_6 = arith.constant 9.99999993E-9 : f32
    %18 = vector.broadcast %cst_6 : f32 to vector<3x4x4xf32>
    %19 = arith.addf %17, %18 : vector<3x4x4xf32>
    %20 = tpu.reciprocal %19 {approx = true} : vector<3x4x4xf32> -> vector<3x4x4xf32>
    %21 = arith.mulf %7, %20 : vector<3x4x4xf32>
    %c0_7 = arith.constant 0 : index
    %c0_8 = arith.constant 0 : index
    %c0_9 = arith.constant 0 : index
    %22 = vector.load %arg2[%c0_7, %c0_8, %c0_9] : memref<3x4x4xf32, #tpu.memory_space<vmem>>, vector<3x4x4xf32>
    tpu.vector_store %arg2[%c0_7, %c0_8, %c0_9], %21 {strides = array<i32>} : memref<3x4x4xf32, #tpu.memory_space<vmem>>, vector<3x4x4xf32>,
    return
  }
  func.func @transform_0(%arg0: i32) -> (i32, i32, i32) {
    %c0_i32 = arith.constant 0 : i32
    %c0_i32_0 = arith.constant 0 : i32
    %c0_i32_1 = arith.constant 0 : i32
    return %arg0, %c0_i32, %c0_i32_0 : i32, i32, i32
  }
  func.func @transform_1(%arg0: i32) -> (i32, i32, i32) {
    %c0_i32 = arith.constant 0 : i32
    %c0_i32_0 = arith.constant 0 : i32
    %c0_i32_1 = arith.constant 0 : i32
    return %arg0, %c0_i32, %c0_i32_0 : i32, i32, i32
  }
}

</mosaic_0001>

<bundles_post_ra>
// kernel: tpu_custom_call.1
= control target key start
LH: loop header
LB: loop body
LE: loop exit
PB: predicated region body
PF: predicated region fallthrough
CT: control target
= control target key end

     0   :  { %6 = vsyncpa [#allocation3], 0  ;;  %s640_s0 = inlined_call_operand.hbm [shape: f32[6,4,10], index: 0, kind: input, shape index: {}]   ;;  %s641_s1 = inlined_call_operand.vmem [shape: f32[6,4,4], index: 1, kind: output, shape index: {}]  }
   0x1   :  { %8 = vsyncpa [#allocation3 + $0x1], 0  ;;  %s543_s6 = smov 0   ;;  %s545_s7 = smov 0  }
   0x2   :  { %s547_s8 = smov 0   ;;  %s549_s9 = smov 0  }
   0x3 LB: > { %s390_s10 = sadd.s32 4294967295, %s528_s9   ;;  %s563_s11 = sadd.s32 1, %s528_s9   ;;  %s528_s9 = sphi %s549_s9, %s647_s9   ;;  %s524_s8 = sphi %s547_s8, %s646_s8   ;;  %s520_s7 = sphi %s545_s7, %s645_s7   ;;  %s516_s6 = sphi %s543_s6, %s644_s6  }
   0x4   : > { %s18_s12 = ssub.s32 %s528_s9, %s563_s11  ;;  %s21_s13 = sadd.s32 1, %s524_s8 }
   0x5   : > { %p19_p0 = scmp.eq.s32.totalorder %s18_s12, 0  ;;  %p28_p1 = scmp.ne.s32.totalorder %s524_s8, %s520_s7 }
   0x6   : > { %p29_p2 = scmp.eq.s32.totalorder %s528_s9, 0  ;;  %p34_p3 = scmp.ne.s32.totalorder %s520_s7, %s516_s6 }
   0x7   : > { %s573_s14 = scalar_select %p19_p0, %s524_s8, %s21_s13  }
   0x8   : > { %p30_p4 = por %p29_p2, %p28_p1  ;;  %p35_p5 = scmp.eq.s32.totalorder %s390_s10, 0 }
   0x9   : > { %p414_p6 = scmp.lt.s32.totalorder %s528_s9, 2  ;;  %s84_s16 = sand.u32 1, %s524_s8  }
   0xa   : > { %p578_p7 = por %p35_p5, %p34_p3  ;;  %s406_s17 = smul.u32 12, %s84_s16 }
   0xb   : > { %s405_s18 = smul.u32 12, %s528_s9  ;;  %p584_p8 = pnand %p414_p6, %p30_p4 }
   0xc   : > { %s88_s23 = scalar_lea.vmem [#allocation2], %s406_s17  ;;  %p395_p9 = scmp.ge.s32.totalorder %s528_s9, 1 }
   0xd   : > { %s93_s22 = scalar_lea.hbm %s640_s0, %s405_s18  ;;  %s96_s24 = sshll.u32 %s88_s23, 4  ;;  %s97_s24 = int_to_ptr.vmem [resolvable:$true] %s96_s24 }
   0xe   : > { %s94_s25 = sshll.u32 %s93_s22, 4  ;;  %s85_s26 = scalar_lea.sflag [#allocation3], %s84_s16  ;;  %s95_s25 = int_to_ptr.hbm [resolvable:$true] %s94_s25 }
   0xf   : > { %s464_s27 = sshra.s32 %s95_s25, 4  ;;  %p468_p11 = pneg %p584_p8  ;;  %s465_s27 = int_to_ptr.hbm [resolvable:$true] %s464_s27 }
  0x10   : > { %s466_s28 = scalar_lea.hbm %s465_s27, 12  ;;  %s471_s2 = scalar_lea.hbm %s640_s0, 24 }
  0x11   : > { %p467_p10 = scmp.ne.s32.totalorder %s465_s27, %s466_s28  ;;  %p472_p0 = scmp.lt.s32.totalorder %s465_s27, %s640_s0 }
  0x12   : > { %p473_p1 = scmp.lt.s32.totalorder %s471_s2, %s466_s28 }
  0x13   : > { %p469_p12 = pnand %p468_p11, %p467_p10 }
  0x14   : > { %p474_p2 = por %p473_p1, %p472_p0 }
  0x15   : > { %p470_p13 = pneg %p469_p12 }
  0x17   : > { %p475_p3 = pnand %p474_p2, %p470_p13 }
  0x19   : > { %478 = shalt.err (!%p475_p3)
}
  0x1a   : > { %s530_s5 = smov 64   ;;  %s531_s6 = smov 4  }
  0x1b   : > { %413 = dma.hbm_to_vmem [thread:$0]  (!%p584_p8), %s95_s25, 192, %s97_s24, %s85_s26, %s530_s5, %s530_s5, %s531_s6  }
  0x1c   : > { %p104_p4 = scmp.lt.s32.totalorder %s528_s9, 3 }
  0x1e   : > { %p105_p5 = pnand %p395_p9, %p104_p4 }
  0x1f   : > { %s110_s12 = sand.u32 (!%p105_p5), 1, %s520_s7  }
  0x20   : > { %108 = sbr.rel (%p105_p5) target bundleno = 327 (0x147), region = 24  ;;  %s111_s16 = scalar_lea.sflag (!%p105_p5), [#allocation3], %s110_s12 }
  0x21   : > { %s407_s13 = smul.u32 (!%p105_p5), 12, %s110_s12 }
  0x23   : > { %s114_s17 = scalar_lea.vmem (!%p105_p5), [#allocation2], %s407_s13 }
  0x25   : > { %511 = dma.done.wait (%p578_p7), %s111_s16, 192  }
  0x26   : > { %513 = vsyncadd (%p578_p7), %s111_s16, 4294967104  ;;  %vm144_vm0 = vcmask 76800   ;;  %v143_v0 = vld [vmem:[%s114_s17 + $0x8] sm:$0xf]  ;;  %v142_v1 = vld [vmem:[%s114_s17 + $0x4] sm:$0xf]  ;;  %v291_v39 = vlaneseq }
  0x27   : > { %v151_v2 = vsel %vm144_vm0, %v143_v0, 0.0  ;;  %v148_v3 = vsel %vm144_vm0, %v142_v1, 0.0  ;;  %v141_v4 = vld [vmem:[%s114_s17] sm:$0xf]  ;;  %v532_v6 = vmov 10.0   ;;  %vm167_vm2 = vcmask 80896  }
  0x28   : > { %152 = vadd.xlane.f32.xlu0 %v151_v2  ;;  %149 = vadd.xlane.f32.xlu1 %v148_v3  ;;  %v145_v5 = vsel %vm144_vm0, %v141_v4, 0.0  ;;  %450 = vrcp.f32 %v532_v6  ;;  %v292_v46 = vand.u32 127, %v291_v39  ;;  %s135_s15 = smul.u32 3, %s390_s10  ;;  %vm319_vm9 = vcmask 27648  }
  0x2a   : > { %p136_p6 = scmp.lt.s32.totalorder %s135_s15, 5 }
  0x2c   : > { %s649_s15 = smov (!%p136_p6, %s135_s15), 5 }
  0x2d   : > { %s396_s9 = sshll.u32 %s649_s15, 2 }
  0x2e   : > { %v451_v7 = vpop.eup %450  ;;  %s139_s19 = scalar_lea.vmem %s641_s1, %s396_s9 }
  0x2f   : > { %v155_v8 = vmul.f32 10.0, %v451_v7  ;;  %vm159_vm1 = vweird.f32 %v451_v7 }
  0x30   : > { %146 = vadd.xlane.f32.xlu0 %v145_v5 }
  0x31   : > { %v156_v9 = vsub.f32 1.0, %v155_v8 }
  0x33   : > { %v157_v10 = vmul.f32 %v451_v7, %v156_v9 }
  0x35   : > { %v158_v11 = vadd.f32 %v451_v7, %v157_v10 }
  0x37   : > { %v160_v12 = vsel %vm159_vm1, %v451_v7, %v158_v11 }
  0x9b   : > { %v153_v13 = vpop.xlane.xlu0 %152  ;;  %v150_v14 = vpop.xlane.xlu1 %149 }
  0x9c   : > { %v163_v15 = vmul.f32 %v160_v12, %v153_v13  ;;  %v162_v16 = vmul.f32 %v160_v12, %v150_v14 }
  0x9e   : > { %v166_v17 = vsub.f32 %v143_v0, %v163_v15  ;;  %v165_v18 = vsub.f32 %v142_v1, %v162_v16 }
  0xa0   : > { %399 = vmatpush.xpose.msk.msra.mxu1 %vm167_vm2, %v165_v18  ;;  %401 = vmatpush.xpose.msk.msra.mxu2 %vm167_vm2, %v166_v17  ;;  %v238_v19 = vmul.f32 %v165_v18, %v165_v18  ;;  %v239_v24 = vmul.f32 %v166_v17, %v166_v17 }
  0xa2   : > { %v243_v20 = vsel %vm144_vm0, %v238_v19, 0.0  ;;  %v246_v26 = vsel %vm144_vm0, %v239_v24, 0.0 }
  0xa3   : > { %402 = vmatmul.msk.f32.vlgmr.msra.gmra.mxu2 %vm167_vm2, %v166_v17  ;;  %244 = vadd.xlane.f32.xlu2 %v243_v20  ;;  %v147_v21 = vpop.xlane.xlu0 %146 }
  0xa4   : > { %400 = vmatmul.msk.f32.vlgmr.msra.gmra.mxu1 %vm167_vm2, %v165_v18  ;;  %v161_v22 = vmul.f32 %v160_v12, %v147_v21 }
  0xa6   : > { %v164_v23 = vsub.f32 %v141_v4, %v161_v22 }
  0xa8   : > { %397 = vmatpush.xpose.msk.msra.mxu0 %vm167_vm2, %v164_v23  ;;  %v237_v25 = vmul.f32 %v164_v23, %v164_v23 }
  0xaa   : > { %v240_v27 = vsel %vm144_vm0, %v237_v25, 0.0 }
  0xab   : > { %247 = vadd.xlane.f32.xlu2 %v246_v26  ;;  %241 = vadd.xlane.f32.xlu1 %v240_v27 }
  0xac   : > { %398 = vmatmul.msk.f32.vlgmr.msra.gmra.mxu0 %vm167_vm2, %v164_v23 }
 0x116   : > { %v245_v28 = vpop.xlane.xlu2 %244 }
 0x117   : > { %v250_v29 = vmul.f32 0.11111111, %v245_v28 }
 0x119   : > { %452 = vrsqrt.f32 %v250_v29  ;;  %vm271_vm3 = vcmp.eq.f32.partialorder %v250_v29, inf  ;;  %v274_v48 = vand.u32 2147483648, %v250_v29  ;;  %vm273_vm4 = vcmp.eq.f32.partialorder %v250_v29, 0.0 }
 0x11e   : > { %v248_v30 = vpop.xlane.xlu2 %247  ;;  %v242_v31 = vpop.xlane.xlu1 %241 }
 0x11f   : > { %v453_v32 = vpop.eup %452  ;;  %v251_v33 = vmul.f32 0.11111111, %v248_v30  ;;  %v249_v34 = vmul.f32 0.11111111, %v242_v31 }
 0x120   : > { %v265_v35 = vmul.f32 %v453_v32, %v250_v29 }
 0x121   : > { %454 = vrsqrt.f32 %v251_v33  ;;  %vm283_vm5 = vcmp.eq.f32.partialorder %v251_v33, inf  ;;  %vm285_vm6 = vcmp.eq.f32.partialorder %v251_v33, 0.0  ;;  %v286_v62 = vand.u32 2147483648, %v251_v33  ;;  %v211_v10 = vpop.f32.mrf.mxu1 }
 0x122   : > { %456 = vrsqrt.f32 %v249_v34  ;;  %v266_v36 = vmul.f32 %v453_v32, %v265_v35  ;;  %vm259_vm7 = vcmp.eq.f32.partialorder %v249_v34, inf  ;;  %v262_v1 = vand.u32 2147483648, %v249_v34 }
 0x123   : > { %vm261_vm8 = vcmp.eq.f32.partialorder %v249_v34, 0.0 }
 0x124   : > { %v267_v37 = vmul.f32 0.5, %v266_v36 }
 0x126   : > { %v268_v38 = vsub.f32 1.5, %v267_v37  ;;  %v234_v15 = vpop.f32.mrf.mxu2 }
 0x127   : > { %v455_v40 = vpop.eup %454 }
 0x128   : > { %v457_v41 = vpop.eup %456  ;;  %v269_v42 = vmul.f32 %v453_v32, %v268_v38  ;;  %v277_v43 = vmul.f32 %v455_v40, %v251_v33 }
 0x129   : > { %v253_v44 = vmul.f32 %v457_v41, %v249_v34  ;;  %v188_v18 = vpop.f32.mrf.mxu0 }
 0x12a   : > { %v270_v45 = vmul.f32 %v269_v42, %v250_v29  ;;  %v278_v47 = vmul.f32 %v455_v40, %v277_v43 }
 0x12b   : > { %v254_v49 = vmul.f32 %v457_v41, %v253_v44 }
 0x12c   : > { %v272_v50 = vsel %vm271_vm3, %v250_v29, %v270_v45  ;;  %v279_v51 = vmul.f32 0.5, %v278_v47 }
 0x12d   : > { %v275_v52 = vsel %vm273_vm4, %v274_v48, %v272_v50  ;;  %v255_v53 = vmul.f32 0.5, %v254_v49 }
 0x12e   : > { %v294_v54 = vperm.slane %v275_v52, %v292_v46  ;;  %v280_v55 = vsub.f32 1.5, %v279_v51 }
 0x12f   : > { %v256_v56 = vsub.f32 1.5, %v255_v53 }
 0x130   : > { %v308_v57 = vmul.f32 %v294_v54, %v275_v52  ;;  %v281_v58 = vmul.f32 %v455_v40, %v280_v55 }
 0x131   : > { %v257_v59 = vmul.f32 %v457_v41, %v256_v56 }
 0x132   : > { %v311_v60 = vadd.f32 1e-08, %v308_v57  ;;  %v282_v61 = vmul.f32 %v281_v58, %v251_v33 }
 0x133   : > { %v258_v63 = vmul.f32 %v257_v59, %v249_v34 }
 0x134   : > { %458 = vrcp.f32 %v311_v60  ;;  %v284_v0 = vsel %vm283_vm5, %v251_v33, %v282_v61 }
 0x135   : > { %v287_v2 = vsel %vm285_vm6, %v286_v62, %v284_v0  ;;  %v260_v3 = vsel %vm259_vm7, %v249_v34, %v258_v63 }
 0x136   : > { %v295_v4 = vperm.slane %v287_v2, %v292_v46  ;;  %v263_v5 = vsel %vm261_vm8, %v262_v1, %v260_v3 }
 0x137   : > { %v293_v6 = vperm.slane %v263_v5, %v292_v46 }
 0x138   : > { %v309_v7 = vmul.f32 %v295_v4, %v287_v2 }
 0x139   : > { %v307_v8 = vmul.f32 %v293_v6, %v263_v5 }
 0x13a   : > { %v459_v9 = vpop.eup %458  ;;  %v312_v11 = vadd.f32 1e-08, %v309_v7 }
 0x13b   : > { %v317_v12 = vmul.f32 %v459_v9, %v211_v10  ;;  %v310_v13 = vadd.f32 1e-08, %v307_v8 }
 0x13c   : > { %460 = vrcp.f32 %v312_v11 }
 0x13d   : > { %321 = vst.msk [vmem:[%s139_s19 + $0x4] sm:$0xf] %vm319_vm9, %v317_v12  ;;  %462 = vrcp.f32 %v310_v13 }
 0x142   : > { %v461_v14 = vpop.eup %460 }
 0x143   : > { %v463_v16 = vpop.eup %462  ;;  %v318_v17 = vmul.f32 %v461_v14, %v234_v15 }
 0x144   : > { %v316_v19 = vmul.f32 %v463_v16, %v188_v18 }
 0x145   : > { %322 = vst.msk [vmem:[%s139_s19 + $0x8] sm:$0xf] %vm319_vm9, %v318_v17 }
 0x146   : > { %320 = vst.msk [vmem:[%s139_s19] sm:$0xf] %vm319_vm9, %v316_v19 }
 0x147 PF: > { %p11_p7 = scmp.ge.s32.totalorder %s563_s11, 4   ;;  %s644_s6 = smov %s520_s7 }
 0x148   : > { %s645_s7 = smov %s524_s8  ;;  %s646_s8 = smov %s573_s14 }
 0x149   : > { %s647_s9 = smov %s563_s11  ;;  %13 = sbr.rel (!%p11_p7) target bundleno = 3 (0x3), region = 64 }
 0x14e   :  { %345 = vsyncpa [#allocation3], 1 }
 0x14f   :  { %347 = vsyncpa [#allocation3 + $0x1], 1 }

</bundles_post_ra>
